<compile_context>
chip_gen: v5e
topology: v5e:2x2
jax: 0.10.0
libtpu: 0.0.40
codegen_flags: <defaults>
</compile_context>

<pallas_src>
import jax
import jax.numpy as jnp
from jax.experimental import pallas as pl
from jax.experimental.pallas import tpu as pltpu

TITLE_DIM = 768      # DistilBERT hidden size
IMAGE_DIM = 2048     # ResNet50 (fc=Identity) feature size
NUM_CLASSES = 2
N_PAD = 128          # classifier lanes padded to one full vreg lane width
NEG_BIG = -1e30      # bias for pad classes -> softmax mass is exactly 0


def _round_up(x, m):
    return ((x + m - 1) // m) * m


# ----------------------------------------------------------------------------
# Pallas kernel: fused (folded) classification head
#   logits = title @ W_cls_title_pad + image @ W_eff_pad + b_eff_pad
#   out    = softmax(logits)            (pad columns carry -1e30 bias -> 0)
# ----------------------------------------------------------------------------
def head_kernel(title_ref, img_ref, w_t_ref, w_i_ref, b_ref, out_ref):
    # bf16 operands, f32 accumulation on the MXU.
    logits = (jnp.dot(title_ref[...], w_t_ref[...],
                      preferred_element_type=jnp.float32)
              + jnp.dot(img_ref[...], w_i_ref[...],
                        preferred_element_type=jnp.float32)
              + b_ref[...])                                  # (TM, 128) f32

    # Numerically stable softmax over the lane axis (f32, exact divide so row
    # sums are 1.0 to f32 precision).
    m = jnp.max(logits, axis=1, keepdims=True)
    e = jnp.exp(logits - m)                                  # pad cols -> 0
    out_ref[...] = e / jnp.sum(e, axis=1, keepdims=True)


# ----------------------------------------------------------------------------
# Parameter folding (done once, offline w.r.t. the kernel).
# Exact in eval mode only: Dropout(p=0.3) is the identity.
# TODO(synk): training-mode dropout would require keeping fc_image separate
# and applying a Bernoulli mask / (1-p) between the two layers.
# ----------------------------------------------------------------------------
def fold_head_params(params):
    w_img = params["w_img"].astype(jnp.float32)              # (2048, 768)
    b_img = params["b_img"].astype(jnp.float32)              # (1, 768)
    w_cls = params["w_cls"].astype(jnp.float32)              # (1536, C)
    b_cls = params["b_cls"].astype(jnp.float32)              # (1, C)
    C = w_cls.shape[1]

    w_cls_t = w_cls[:TITLE_DIM]                              # (768, C)
    w_cls_i = w_cls[TITLE_DIM:]                              # (768, C)
    w_eff = w_img @ w_cls_i                                  # (2048, C)
    b_eff = b_img @ w_cls_i + b_cls                          # (1, C)

    # Pad the class axis to a full 128-lane width.
    w_t_pad = jnp.zeros((TITLE_DIM, N_PAD), jnp.float32).at[:, :C].set(w_cls_t)
    w_i_pad = jnp.zeros((IMAGE_DIM, N_PAD), jnp.float32).at[:, :C].set(w_eff)
    b_pad = jnp.full((1, N_PAD), NEG_BIG, jnp.float32).at[:, :C].set(b_eff)

    return {
        "w_t": w_t_pad.astype(jnp.bfloat16),                 # (768, 128)  bf16
        "w_i": w_i_pad.astype(jnp.bfloat16),                 # (2048, 128) bf16
        "b": b_pad,                                          # (1, 128)    f32
        "num_classes": C,
    }


def fake_news_head(title_feat, image_feat, folded):
    """Fused head. title_feat: (B,768), image_feat: (B,2048) -> (B,C) probs."""
    B = title_feat.shape[0]
    C = folded["num_classes"]

    # Pick a batch tile that fits VMEM comfortably on every generation
    # (incl. v7x's 64 MiB), then pad the batch to a multiple of the tile so
    # the grid never issues partial blocks:
    #   resident weights ~0.7 MiB bf16 (x2 buffers)
    #   2 x TM x (2048+768) x 2B inputs + 2 x TM x 128 x 4B output ~7 MiB @ TM=512
    b8 = _round_up(max(B, 1), 8)
    tm = min(512, b8)
    b_pad = _round_up(b8, tm)

    title_bf = title_feat.astype(jnp.bfloat16)
    img_bf = image_feat.astype(jnp.bfloat16)
    if b_pad != B:
        title_bf = jnp.pad(title_bf, ((0, b_pad - B), (0, 0)))
        img_bf = jnp.pad(img_bf, ((0, b_pad - B), (0, 0)))

    probs_pad = pl.pallas_call(
        head_kernel,
        out_shape=jax.ShapeDtypeStruct((b_pad, N_PAD), jnp.float32),
        grid=(b_pad // tm,),
        in_specs=[
            pl.BlockSpec((tm, TITLE_DIM), lambda i: (i, 0)),        # streamed
            pl.BlockSpec((tm, IMAGE_DIM), lambda i: (i, 0)),        # streamed
            pl.BlockSpec((TITLE_DIM, N_PAD), lambda i: (0, 0)),     # resident
            pl.BlockSpec((IMAGE_DIM, N_PAD), lambda i: (0, 0)),     # resident
            pl.BlockSpec((1, N_PAD), lambda i: (0, 0)),             # resident
        ],
        out_specs=pl.BlockSpec((tm, N_PAD), lambda i: (i, 0)),
        compiler_params=pltpu.CompilerParams(
            dimension_semantics=("parallel",),
            vmem_limit_bytes=32 << 20,
        ),
    )(title_bf, img_bf, folded["w_t"], folded["w_i"], folded["b"])

    return probs_pad[:B, :C]


# ----------------------------------------------------------------------------
# Deterministic surrogate backbones (plain-JAX glue).
# ----------------------------------------------------------------------------
def title_backbone(input_ids, attention_mask, emb_table):
    # TODO(synk): DistilBertModel replaced by a deterministic embedding-lookup
    # surrogate; the real pretrained transformer stack cannot be reproduced here.
    hidden = emb_table[input_ids]                             # (B, S, 768)
    hidden = hidden * attention_mask[..., None].astype(hidden.dtype)
    return hidden[:, 0, :]                                    # CLS token (B, 768)


def image_backbone(image_nchw, proj):
    # TODO(synk): ResNet50 replaced by global-average-pool + linear surrogate.
    pooled = jnp.mean(image_nchw, axis=(2, 3))                # (B, C)
    return pooled @ proj                                      # (B, 2048)


def init_params(key, num_classes=NUM_CLASSES, vocab=1000, img_channels=3):
    ks = jax.random.split(key, 6)
    return {
        "emb_table": 0.02 * jax.random.normal(ks[0], (vocab, TITLE_DIM), jnp.float32),
        "img_proj":  0.02 * jax.random.normal(ks[1], (img_channels, IMAGE_DIM), jnp.float32),
        "w_img":     0.02 * jax.random.normal(ks[2], (IMAGE_DIM, TITLE_DIM), jnp.float32),
        "b_img":     0.01 * jax.random.normal(ks[3], (1, TITLE_DIM), jnp.float32),
        "w_cls":     0.02 * jax.random.normal(ks[4], (2 * TITLE_DIM, num_classes), jnp.float32),
        "b_cls":     0.01 * jax.random.normal(ks[5], (1, num_classes), jnp.float32),
    }


def fake_news_detector(params, folded, title_input_ids, title_attention_mask, image):
    title_feat = title_backbone(title_input_ids, title_attention_mask,
                                params["emb_table"]).astype(jnp.float32)
    image_feat = image_backbone(image, params["img_proj"]).astype(jnp.float32)
    return fake_news_head(title_feat, image_feat, folded)


def reference_head(title_feat, image_feat, params):
    """Un-folded f32 reference matching the PyTorch graph (eval mode)."""
    img_proj = image_feat @ params["w_img"] + params["b_img"]
    concat = jnp.concatenate([title_feat, img_proj], axis=1)
    logits = concat @ params["w_cls"] + params["b_cls"]
    return jax.nn.softmax(logits, axis=1)


if __name__ == "__main__":
    key = jax.random.PRNGKey(0)
    kp, ki, kx = jax.random.split(key, 3)

    params = init_params(kp)
    folded = fold_head_params(params)

    B, S = 2, 8
    title_input_ids = jax.random.randint(ki, (B, S), 0, 1000, dtype=jnp.int32)
    title_attention_mask = jnp.ones((B, S), jnp.int32)
    image = jax.random.normal(kx, (B, 3, 16, 16), jnp.float32)   # NCHW

    probs = fake_news_detector(params, folded, title_input_ids,
                               title_attention_mask, image)
    jax.block_until_ready(probs)

    # sanity: shape, rows sum to 1, matches the un-folded f32 reference.
    assert probs.shape == (B, NUM_CLASSES)
    assert bool(jnp.allclose(jnp.sum(probs, axis=1), 1.0, atol=1e-5))

    title_feat = title_backbone(title_input_ids, title_attention_mask,
                                params["emb_table"]).astype(jnp.float32)
    image_feat = image_backbone(image, params["img_proj"]).astype(jnp.float32)
    ref = reference_head(title_feat, image_feat, params)
    assert bool(jnp.allclose(probs, ref, atol=2e-2))

    print("KERNEL_OK")
</pallas_src>

<mosaic_0001>
module attributes {stable_mosaic.version = 11 : i64} {
  func.func @head_kernel(%arg0: i32, %arg1: memref<8x768xbf16, #tpu.memory_space<vmem>>, %arg2: memref<8x2048xbf16, #tpu.memory_space<vmem>>, %arg3: memref<768x128xbf16, #tpu.memory_space<vmem>>, %arg4: memref<2048x128xbf16, #tpu.memory_space<vmem>>, %arg5: memref<1x128xf32, #tpu.memory_space<vmem>>, %arg6: memref<8x128xf32, #tpu.memory_space<vmem>>) attributes {dimension_semantics = [#tpu.dimension_semantics<parallel>], iteration_bounds = array<i64: 1>, scalar_prefetch = 0 : i64, scratch_operands = 0 : i64, tpu.core_type = #tpu.core_type<tc>, window_params = [{transform_indices = @transform_0, window_bounds = array<i64: 8, 768>}, {transform_indices = @transform_1, window_bounds = array<i64: 8, 2048>}, {pipeline_mode = #tpu.pipeline_mode<synchronous>, transform_indices = @transform_2, window_bounds = array<i64: 768, 128>}, {pipeline_mode = #tpu.pipeline_mode<synchronous>, transform_indices = @transform_3, window_bounds = array<i64: 2048, 128>}, {pipeline_mode = #tpu.pipeline_mode<synchronous>, transform_indices = @transform_4, window_bounds = array<i64: 1, 128>}, {transform_indices = @transform_5, window_bounds = array<i64: 8, 128>}]} {
    %c0 = arith.constant 0 : index
    %c0_0 = arith.constant 0 : index
    %0 = vector.load %arg1[%c0, %c0_0] : memref<8x768xbf16, #tpu.memory_space<vmem>>, vector<8x768xbf16>
    %c0_1 = arith.constant 0 : index
    %c0_2 = arith.constant 0 : index
    %1 = vector.load %arg3[%c0_1, %c0_2] : memref<768x128xbf16, #tpu.memory_space<vmem>>, vector<768x128xbf16>
    %cst = arith.constant dense<0.000000e+00> : vector<8x128xf32>
    %2 = tpu.matmul %0, %1, %cst {dimension_numbers = #tpu.dot_dimension_numbers<[1], [0], [0], [1], [0, 0, 1, 1], [], []>} : vector<8x768xbf16>, vector<768x128xbf16>, vector<8x128xf32> -> vector<8x128xf32>
    %c0_3 = arith.constant 0 : index
    %c0_4 = arith.constant 0 : index
    %3 = vector.load %arg2[%c0_3, %c0_4] : memref<8x2048xbf16, #tpu.memory_space<vmem>>, vector<8x2048xbf16>
    %c0_5 = arith.constant 0 : index
    %c0_6 = arith.constant 0 : index
    %4 = vector.load %arg4[%c0_5, %c0_6] : memref<2048x128xbf16, #tpu.memory_space<vmem>>, vector<2048x128xbf16>
    %cst_7 = arith.constant dense<0.000000e+00> : vector<8x128xf32>
    %5 = tpu.matmul %3, %4, %cst_7 {dimension_numbers = #tpu.dot_dimension_numbers<[1], [0], [0], [1], [0, 0, 1, 1], [], []>} : vector<8x2048xbf16>, vector<2048x128xbf16>, vector<8x128xf32> -> vector<8x128xf32>
    %6 = arith.addf %2, %5 : vector<8x128xf32>
    %c0_8 = arith.constant 0 : index
    %c0_9 = arith.constant 0 : index
    %7 = vector.load %arg5[%c0_8, %c0_9] : memref<1x128xf32, #tpu.memory_space<vmem>>, vector<1x128xf32>
    %8 = vector.broadcast %7 : vector<1x128xf32> to vector<8x128xf32>
    %9 = arith.addf %6, %8 : vector<8x128xf32>
    %cst_10 = arith.constant dense<0xFF800000> : vector<8xf32>
    %10 = vector.multi_reduction <maximumf>, %9, %cst_10 [1] : vector<8x128xf32> to vector<8xf32>
    %11 = vector.shape_cast %10 : vector<8xf32> to vector<8x1xf32>
    %12 = vector.broadcast %11 : vector<8x1xf32> to vector<8x128xf32>
    %13 = arith.subf %9, %12 : vector<8x128xf32>
    %14 = math.exp %13 : vector<8x128xf32>
    %cst_11 = arith.constant dense<0.000000e+00> : vector<8xf32>
    %15 = vector.multi_reduction <add>, %14, %cst_11 [1] : vector<8x128xf32> to vector<8xf32>
    %16 = vector.shape_cast %15 : vector<8xf32> to vector<8x1xf32>
    %17 = vector.broadcast %16 : vector<8x1xf32> to vector<8x128xf32>
    %18 = arith.divf %14, %17 : vector<8x128xf32>
    %c0_12 = arith.constant 0 : index
    %c0_13 = arith.constant 0 : index
    %19 = vector.load %arg6[%c0_12, %c0_13] : memref<8x128xf32, #tpu.memory_space<vmem>>, vector<8x128xf32>
    tpu.vector_store %arg6[%c0_12, %c0_13], %18 {strides = array<i32>} : memref<8x128xf32, #tpu.memory_space<vmem>>, vector<8x128xf32>,
    return
  }
  func.func @transform_0(%arg0: i32) -> (i32, i32) {
    %c0_i32 = arith.constant 0 : i32
    %c0_i32_0 = arith.constant 0 : i32
    return %arg0, %c0_i32 : i32, i32
  }
  func.func @transform_1(%arg0: i32) -> (i32, i32) {
    %c0_i32 = arith.constant 0 : i32
    %c0_i32_0 = arith.constant 0 : i32
    return %arg0, %c0_i32 : i32, i32
  }
  func.func @transform_2(%arg0: i32) -> (i32, i32) {
    %c0_i32 = arith.constant 0 : i32
    %c0_i32_0 = arith.constant 0 : i32
    %c0_i32_1 = arith.constant 0 : i32
    return %c0_i32, %c0_i32_0 : i32, i32
  }
  func.func @transform_3(%arg0: i32) -> (i32, i32) {
    %c0_i32 = arith.constant 0 : i32
    %c0_i32_0 = arith.constant 0 : i32
    %c0_i32_1 = arith.constant 0 : i32
    return %c0_i32, %c0_i32_0 : i32, i32
  }
  func.func @transform_4(%arg0: i32) -> (i32, i32) {
    %c0_i32 = arith.constant 0 : i32
    %c0_i32_0 = arith.constant 0 : i32
    %c0_i32_1 = arith.constant 0 : i32
    return %c0_i32, %c0_i32_0 : i32, i32
  }
  func.func @transform_5(%arg0: i32) -> (i32, i32) {
    %c0_i32 = arith.constant 0 : i32
    %c0_i32_0 = arith.constant 0 : i32
    return %arg0, %c0_i32 : i32, i32
  }
}

</mosaic_0001>

<bundles_post_ra>
// kernel: tpu_custom_call.1
= control target key start
LH: loop header
LB: loop body
LE: loop exit
PB: predicated region body
PF: predicated region fallthrough
CT: control target
= control target key end

     0   :  { %10 = vsyncpa [#allocation3], 0  ;;  %s2984_s0 = inlined_call_operand.hbm [shape: bf16[8,768], index: 0, kind: input, shape index: {}]   ;;  %s2985_s1 = inlined_call_operand.hbm [shape: bf16[8,2048], index: 1, kind: input, shape index: {}]   ;;  %s2986_s2 = inlined_call_operand.hbm [shape: bf16[768,128], index: 2, kind: input, shape index: {}]   ;;  %s2987_s3 = inlined_call_operand.hbm [shape: bf16[2048,128], index: 3, kind: input, shape index: {}]   ;;  %s2988_s4 = inlined_call_operand.vmem [shape: f32[1,128], index: 4, kind: input, shape index: {}]   ;;  %s2989_s5 = inlined_call_operand.hbm [shape: f32[8,128], index: 5, kind: output, shape index: {}]  }
   0x1   :  { %11 = vsyncpa [#allocation6], 0 }
   0x2   :  { %12 = vsyncpa [#allocation9], 0  ;;  %s30_s20 = sshll.u32 %s2985_s1, 4  ;;  %s31_s20 = int_to_ptr.hbm [resolvable:$true] %s30_s20 }
   0x3   :  { %13 = vsyncpa [#allocation4], 0  ;;  %s2929_s21 = smov [#allocation5]   ;;  %s19_s25 = sshll.u32 %s2984_s0, 4  ;;  %s20_s25 = int_to_ptr.hbm [resolvable:$true] %s19_s25 }
   0x4   :  { %s32_s22 = sshll.u32 %s2929_s21, 4  ;;  %s2930_s26 = smov [#allocation2]   ;;  %s33_s22 = int_to_ptr.vmem [resolvable:$true] %s32_s22 }
   0x5   :  { %35 = dma.hbm_to_vmem [thread:$0]  %s31_s20, 1024, %s33_s22, [#allocation6]  }
   0x6   :  { %s21_s27 = sshll.u32 %s2930_s26, 4  ;;  %s40_s30 = sshll.u32 %s2986_s2, 4  ;;  %s22_s27 = int_to_ptr.vmem [resolvable:$true] %s21_s27  ;;  %s41_s30 = int_to_ptr.hbm [resolvable:$true] %s40_s30 }
   0x7   :  { %24 = dma.hbm_to_vmem [thread:$0]  %s20_s25, 384, %s22_s27, [#allocation3]  }
   0x8   :  { %s2931_s1 = smov [#allocation7]   ;;  %s53_s9 = sshll.u32 %s2987_s3, 4  ;;  %s54_s9 = int_to_ptr.hbm [resolvable:$true] %s53_s9 }
   0x9   :  { %s42_s6 = sshll.u32 %s2931_s1, 4  ;;  %s2932_s10 = smov 64   ;;  %s43_s6 = int_to_ptr.vmem [resolvable:$true] %s42_s6 }
   0xa   :  { %s2933_s0 = smov 4   ;;  %s2934_s11 = smov [#allocation8]  }
   0xb   :  { %48 = dma.hbm_to_vmem [thread:$0]  %s41_s30, 6144, %s43_s6, [#allocation6], %s2932_s10, %s2932_s10, %s2933_s0  }
   0xc   :  { %s55_s12 = sshll.u32 %s2934_s11, 4  ;;  %s56_s12 = int_to_ptr.vmem [resolvable:$true] %s55_s12 }
   0xd   :  { %61 = dma.hbm_to_vmem [thread:$0]  %s54_s9, 16384, %s56_s12, [#allocation9], %s2932_s10, %s2932_s10, %s2933_s0  }
   0xe   :  { %2921 = dma.done.wait [#allocation3], 384  }
   0xf   :  { %2922 = vsyncadd [#allocation3], 4294966912 }
  0x10   :  { %2923 = dma.done.wait [#allocation6], 7168  }
  0x11   :  { %2924 = vsyncadd [#allocation6], 4294960128 }
  0x12   :  { %2925 = dma.done.wait [#allocation9], 16384  }
  0x13   :  { %2926 = vsyncadd [#allocation9], 4294950912  ;;  %v2668_v0 = vld [vmem:[#allocation8 + $0x38] sm:$0xff]  ;;  %v2667_v4 = vld [vmem:[#allocation8 + $0x30] sm:$0xff]  ;;  %s1897_s16 = sshll.u32 %s2989_s5, 4  ;;  %s1898_s16 = int_to_ptr.hbm [resolvable:$true] %s1897_s16 }
  0x14   :  { %v2676_v1 = vld [vmem:[#allocation8 + $0x78] sm:$0xff]  ;;  %1267 = vmatpush.bf16.msra.mxu0 %v2668_v0  ;;  %v2675_v5 = vld [vmem:[#allocation8 + $0x70] sm:$0xff]  ;;  %v2666_v8 = vld [vmem:[#allocation8 + $0x28] sm:$0xff] }
  0x15   :  { %v2684_v2 = vld [vmem:[#allocation8 + $0xb8] sm:$0xff]  ;;  %1280 = vmatpush.bf16.msra.mxu1 %v2676_v1  ;;  %v2683_v6 = vld [vmem:[#allocation8 + $0xb0] sm:$0xff]  ;;  %v2674_v9 = vld [vmem:[#allocation8 + $0x68] sm:$0xff] }
  0x16   :  { %v2692_v3 = vld [vmem:[#allocation8 + $0xf8] sm:$0xff]  ;;  %1293 = vmatpush.bf16.msra.mxu2 %v2684_v2  ;;  %v2691_v7 = vld [vmem:[#allocation8 + $0xf0] sm:$0xff]  ;;  %v2682_v10 = vld [vmem:[#allocation8 + $0xa8] sm:$0xff] }
  0x17   :  { %1306 = vmatpush.bf16.msra.mxu3 %v2692_v3  ;;  %v2690_v11 = vld [vmem:[#allocation8 + $0xe8] sm:$0xff]  ;;  %v2665_v12 = vld [vmem:[#allocation8 + $0x20] sm:$0xff]  ;;  %v2664_v16 = vld [vmem:[#allocation8 + $0x18] sm:$0xff] }
  0x18   :  { %1268 = vmatpush.bf16.msra.mxu0 %v2667_v4  ;;  %v2673_v13 = vld [vmem:[#allocation8 + $0x60] sm:$0xff]  ;;  %v2672_v17 = vld [vmem:[#allocation8 + $0x58] sm:$0xff]  ;;  %v2663_v20 = vld [vmem:[#allocation8 + $0x10] sm:$0xff] }
  0x19   :  { %1281 = vmatpush.bf16.msra.mxu1 %v2675_v5  ;;  %v2681_v14 = vld [vmem:[#allocation8 + $0xa0] sm:$0xff]  ;;  %v2680_v18 = vld [vmem:[#allocation8 + $0x98] sm:$0xff]  ;;  %v2671_v21 = vld [vmem:[#allocation8 + $0x50] sm:$0xff] }
  0x1a   :  { %1294 = vmatpush.bf16.msra.mxu2 %v2683_v6  ;;  %v2689_v15 = vld [vmem:[#allocation8 + $0xe0] sm:$0xff]  ;;  %v2688_v19 = vld [vmem:[#allocation8 + $0xd8] sm:$0xff]  ;;  %v2679_v22 = vld [vmem:[#allocation8 + $0x90] sm:$0xff] }
  0x1b   :  { %1307 = vmatpush.bf16.msra.mxu3 %v2691_v7  ;;  %v2687_v23 = vld [vmem:[#allocation8 + $0xd0] sm:$0xff]  ;;  %v2662_v24 = vld [vmem:[#allocation8 + $0x8] sm:$0xff]  ;;  %v179_v26 = vld [vmem:[#allocation5] sm:$0xff] }
  0x1c   :  { %1269 = vmatpush.bf16.msra.mxu0 %v2666_v8  ;;  %v2670_v25 = vld [vmem:[#allocation8 + $0x48] sm:$0xff]  ;;  %v451_v30 = vunpack.c.l.b16 %v179_v26  ;;  %v2661_v31 = vld [vmem:[#allocation8] sm:$0xff]  ;;  %v2700_v35 = vld [vmem:[#allocation8 + $0x138] sm:$0xff]  ;;  %v452_v36 = vunpack.c.h.b16 %v179_v26 }
  0x1d   :  { %1282 = vmatpush.bf16.msra.mxu1 %v2674_v9  ;;  %v2678_v27 = vld [vmem:[#allocation8 + $0x88] sm:$0xff]  ;;  %v2669_v32 = vld [vmem:[#allocation8 + $0x40] sm:$0xff]  ;;  %v2708_v37 = vld [vmem:[#allocation8 + $0x178] sm:$0xff] }
  0x1e   :  { %1295 = vmatpush.bf16.msra.mxu2 %v2682_v10  ;;  %v2686_v28 = vld [vmem:[#allocation8 + $0xc8] sm:$0xff]  ;;  %v2677_v34 = vld [vmem:[#allocation8 + $0x80] sm:$0xff]  ;;  %v2716_v38 = vld [vmem:[#allocation8 + $0x1b8] sm:$0xff]  ;;  %v467_v40 = vpack.c.b16 %v451_v30, %v451_v30  ;;  %v468_v45 = vpack.c.b16 %v452_v36, %v452_v36 }
  0x1f   :  { %1308 = vmatpush.bf16.msra.mxu3 %v2690_v11  ;;  %v180_v29 = vld [vmem:[#allocation5 + $0x8] sm:$0xff]  ;;  %v2685_v39 = vld [vmem:[#allocation8 + $0xc0] sm:$0xff]  ;;  %v2724_v42 = vld [vmem:[#allocation8 + $0x1f8] sm:$0xff] }
  0x20   :  { %1270 = vmatpush.bf16.msra.mxu0 %v2665_v12  ;;  %v453_v33 = vunpack.c.l.b16 %v180_v29  ;;  %v454_v41 = vunpack.c.h.b16 %v180_v29  ;;  %v2699_v44 = vld [vmem:[#allocation8 + $0x130] sm:$0xff]  ;;  %v2698_v50 = vld [vmem:[#allocation8 + $0x128] sm:$0xff]  ;;  %v2697_v54 = vld [vmem:[#allocation8 + $0x120] sm:$0xff] }
  0x21   :  { %1283 = vmatpush.bf16.msra.mxu1 %v2673_v13  ;;  %v2707_v46 = vld [vmem:[#allocation8 + $0x170] sm:$0xff]  ;;  %v2706_v51 = vld [vmem:[#allocation8 + $0x168] sm:$0xff]  ;;  %v2705_v55 = vld [vmem:[#allocation8 + $0x160] sm:$0xff] }
  0x22   :  { %1296 = vmatpush.bf16.msra.mxu2 %v2681_v14  ;;  %v469_v43 = vpack.c.b16 %v453_v33, %v453_v33  ;;  %v2715_v47 = vld [vmem:[#allocation8 + $0x1b0] sm:$0xff]  ;;  %v470_v48 = vpack.c.b16 %v454_v41, %v454_v41  ;;  %v2714_v52 = vld [vmem:[#allocation8 + $0x1a8] sm:$0xff]  ;;  %v2713_v56 = vld [vmem:[#allocation8 + $0x1a0] sm:$0xff] }
  0x23   :  { %1309 = vmatpush.bf16.msra.mxu3 %v2689_v15  ;;  %v2723_v49 = vld [vmem:[#allocation8 + $0x1f0] sm:$0xff]  ;;  %v2722_v53 = vld [vmem:[#allocation8 + $0x1e8] sm:$0xff]  ;;  %v2721_v57 = vld [vmem:[#allocation8 + $0x1e0] sm:$0xff] }
  0x24   :  { %1271 = vmatpush.bf16.msra.mxu0 %v2664_v16  ;;  %v2696_v58 = vld [vmem:[#allocation8 + $0x118] sm:$0xff]  ;;  %v2695_v62 = vld [vmem:[#allocation8 + $0x110] sm:$0xff]  ;;  %v2694_v2 = vld [vmem:[#allocation8 + $0x108] sm:$0xff] }
  0x25   :  { %1284 = vmatpush.bf16.msra.mxu1 %v2672_v17  ;;  %v2704_v59 = vld [vmem:[#allocation8 + $0x158] sm:$0xff]  ;;  %v2703_v63 = vld [vmem:[#allocation8 + $0x150] sm:$0xff]  ;;  %v2702_v3 = vld [vmem:[#allocation8 + $0x148] sm:$0xff] }
  0x26   :  { %1297 = vmatpush.bf16.msra.mxu2 %v2680_v18  ;;  %v2712_v60 = vld [vmem:[#allocation8 + $0x198] sm:$0xff]  ;;  %v2711_v0 = vld [vmem:[#allocation8 + $0x190] sm:$0xff]  ;;  %v2710_v4 = vld [vmem:[#allocation8 + $0x188] sm:$0xff] }
  0x27   :  { %1310 = vmatpush.bf16.msra.mxu3 %v2688_v19  ;;  %v2720_v61 = vld [vmem:[#allocation8 + $0x1d8] sm:$0xff]  ;;  %v2719_v1 = vld [vmem:[#allocation8 + $0x1d0] sm:$0xff]  ;;  %v2718_v7 = vld [vmem:[#allocation8 + $0x1c8] sm:$0xff] }
  0x28   :  { %1272 = vmatpush.bf16.msra.mxu0 %v2663_v20  ;;  %v182_v5 = vld [vmem:[#allocation5 + $0x18] sm:$0xff]  ;;  %v181_v6 = vld [vmem:[#allocation5 + $0x10] sm:$0xff]  ;;  %v2693_v8 = vld [vmem:[#allocation8 + $0x100] sm:$0xff] }
  0x29   :  { %1285 = vmatpush.bf16.msra.mxu1 %v2671_v21  ;;  %v457_v9 = vunpack.c.l.b16 %v182_v5  ;;  %v2701_v10 = vld [vmem:[#allocation8 + $0x140] sm:$0xff]  ;;  %v455_v12 = vunpack.c.l.b16 %v181_v6  ;;  %v456_v13 = vunpack.c.h.b16 %v181_v6  ;;  %v2732_v14 = vld [vmem:[#allocation8 + $0x238] sm:$0xff]  ;;  %v458_v18 = vunpack.c.h.b16 %v182_v5  ;;  %v2738_v29 = vld [vmem:[#allocation8 + $0x268] sm:$0xff] }
  0x2a   :  { %1298 = vmatpush.bf16.msra.mxu2 %v2679_v22  ;;  %v2709_v11 = vld [vmem:[#allocation8 + $0x180] sm:$0xff]  ;;  %v2740_v15 = vld [vmem:[#allocation8 + $0x278] sm:$0xff]  ;;  %v2746_v30 = vld [vmem:[#allocation8 + $0x2a8] sm:$0xff] }
  0x2b   :  { %1311 = vmatpush.bf16.msra.mxu3 %v2687_v23  ;;  %v2748_v16 = vld [vmem:[#allocation8 + $0x2b8] sm:$0xff]  ;;  %v2717_v17 = vld [vmem:[#allocation8 + $0x1c0] sm:$0xff]  ;;  %v473_v20 = vpack.c.b16 %v457_v9, %v457_v9  ;;  %v471_v21 = vpack.c.b16 %v455_v12, %v455_v12  ;;  %v472_v22 = vpack.c.b16 %v456_v13, %v456_v13  ;;  %v2731_v23 = vld [vmem:[#allocation8 + $0x230] sm:$0xff]  ;;  %v474_v26 = vpack.c.b16 %v458_v18, %v458_v18 }
  0x2c   :  { %1273 = vmatpush.bf16.msra.mxu0 %v2662_v24  ;;  %v2756_v19 = vld [vmem:[#allocation8 + $0x2f8] sm:$0xff]  ;;  %v2739_v24 = vld [vmem:[#allocation8 + $0x270] sm:$0xff]  ;;  %v2737_v33 = vld [vmem:[#allocation8 + $0x260] sm:$0xff] }
  0x2d   :  { %1286 = vmatpush.bf16.msra.mxu1 %v2670_v25  ;;  %v2747_v25 = vld [vmem:[#allocation8 + $0x2b0] sm:$0xff]  ;;  %v2728_v36 = vld [vmem:[#allocation8 + $0x218] sm:$0xff]  ;;  %v2762_v6 = vld [vmem:[#allocation8 + $0x328] sm:$0xff] }
  0x2e   :  { %1299 = vmatpush.bf16.msra.mxu2 %v2678_v27  ;;  %v2755_v27 = vld [vmem:[#allocation8 + $0x2f0] sm:$0xff]  ;;  %v2786_v9 = vld [vmem:[#allocation8 + $0x3e8] sm:$0xff]  ;;  %v2777_v12 = vld [vmem:[#allocation8 + $0x3a0] sm:$0xff] }
  0x2f   :  { %1312 = vmatpush.bf16.msra.mxu3 %v2686_v28  ;;  %v2730_v28 = vld [vmem:[#allocation8 + $0x228] sm:$0xff]  ;;  %v2735_v41 = vld [vmem:[#allocation8 + $0x250] sm:$0xff]  ;;  %v2785_v13 = vld [vmem:[#allocation8 + $0x3e0] sm:$0xff] }
  0x30   :  { %1274 = vmatpush.bf16.msra.mxu0 %v2661_v31  ;;  %v2754_v31 = vld [vmem:[#allocation8 + $0x2e8] sm:$0xff]  ;;  %v2787_v5 = vld [vmem:[#allocation8 + $0x3f0] sm:$0xff] }
  0x31   :  { %1287 = vmatpush.bf16.msra.mxu1 %v2669_v32  ;;  %v2729_v32 = vld [vmem:[#allocation8 + $0x220] sm:$0xff]  ;;  %v2759_v18 = vld [vmem:[#allocation8 + $0x310] sm:$0xff] }
  0x32   :  { %1300 = vmatpush.bf16.msra.mxu2 %v2677_v34  ;;  %v2745_v34 = vld [vmem:[#allocation8 + $0x2a0] sm:$0xff] }
  0x33   :  { %1313 = vmatpush.bf16.msra.mxu3 %v2685_v39  ;;  %1275 = vmatmul.bf16.vlgmr.msra.gmra.mxu0 %v467_v40  ;;  %v2752_v39 = vld [vmem:[#allocation8 + $0x2d8] sm:$0xff]  ;;  %v2727_v40 = vld [vmem:[#allocation8 + $0x210] sm:$0xff] }
  0x34   :  { %1319 = vmatpush.bf16.msrb.mxu0 %v2700_v35  ;;  %1288 = vmatmul.bf16.vlgmr.msra.gmra.mxu1 %v468_v45  ;;  %v2753_v35 = vld [vmem:[#allocation8 + $0x2e0] sm:$0xff]  ;;  %v2734_v45 = vld [vmem:[#allocation8 + $0x248] sm:$0xff] }
  0x35   :  { %1332 = vmatpush.bf16.msrb.mxu1 %v2708_v37  ;;  %1301 = vmatmul.bf16.vlgmr.msra.gmra.mxu2 %v469_v43  ;;  %v2736_v37 = vld [vmem:[#allocation8 + $0x258] sm:$0xff]  ;;  %v2751_v43 = vld [vmem:[#allocation8 + $0x2d0] sm:$0xff] }
  0x36   :  { %1345 = vmatpush.bf16.msrb.mxu2 %v2716_v38  ;;  %1314 = vmatmul.bf16.vlgmr.msra.gmra.mxu3 %v470_v48  ;;  %v2744_v38 = vld [vmem:[#allocation8 + $0x298] sm:$0xff]  ;;  %v184_v48 = vld [vmem:[#allocation5 + $0x28] sm:$0xff] }
  0x37   :  { %1358 = vmatpush.bf16.msrb.mxu3 %v2724_v42  ;;  %v2743_v42 = vld [vmem:[#allocation8 + $0x290] sm:$0xff] }
  0x38   :  { %1320 = vmatpush.bf16.msrb.mxu0 %v2699_v44  ;;  %v2726_v44 = vld [vmem:[#allocation8 + $0x208] sm:$0xff] }
  0x39   :  { %1333 = vmatpush.bf16.msrb.mxu1 %v2707_v46  ;;  %v183_v46 = vld [vmem:[#allocation5 + $0x20] sm:$0xff] }
  0x3a   :  { %1346 = vmatpush.bf16.msrb.mxu2 %v2715_v47  ;;  %v2742_v47 = vld [vmem:[#allocation8 + $0x288] sm:$0xff] }
  0x3b   :  { %1359 = vmatpush.bf16.msrb.mxu3 %v2723_v49  ;;  %v2750_v49 = vld [vmem:[#allocation8 + $0x2c8] sm:$0xff] }
  0x3c   :  { %1321 = vmatpush.bf16.msrb.mxu0 %v2698_v50  ;;  %v459_v50 = vunpack.c.l.b16 %v183_v46 }
  0x3d   :  { %1334 = vmatpush.bf16.msrb.mxu1 %v2706_v51  ;;  %v2725_v51 = vld [vmem:[#allocation8 + $0x200] sm:$0xff] }
  0x3e   :  { %1347 = vmatpush.bf16.msrb.mxu2 %v2714_v52  ;;  %v2733_v52 = vld [vmem:[#allocation8 + $0x240] sm:$0xff] }
  0x3f   :  { %1360 = vmatpush.bf16.msrb.mxu3 %v2722_v53  ;;  %v461_v53 = vunpack.c.l.b16 %v184_v48 }
  0x40   :  { %1322 = vmatpush.bf16.msrb.mxu0 %v2697_v54  ;;  %v2741_v54 = vld [vmem:[#allocation8 + $0x280] sm:$0xff] }
  0x41   :  { %1335 = vmatpush.bf16.msrb.mxu1 %v2705_v55  ;;  %v2764_v55 = vld [vmem:[#allocation8 + $0x338] sm:$0xff] }
  0x42   :  { %1348 = vmatpush.bf16.msrb.mxu2 %v2713_v56  ;;  %v460_v56 = vunpack.c.h.b16 %v183_v46  ;;  %v2635_v46 = vld [vmem:[#allocation7 + $0xb0] sm:$0xff] }
  0x43   :  { %1361 = vmatpush.bf16.msrb.mxu3 %v2721_v57  ;;  %v2772_v57 = vld [vmem:[#allocation8 + $0x378] sm:$0xff] }
  0x44   :  { %1323 = vmatpush.bf16.msrb.mxu0 %v2696_v58  ;;  %v2780_v58 = vld [vmem:[#allocation8 + $0x3b8] sm:$0xff] }
  0x45   :  { %1336 = vmatpush.bf16.msrb.mxu1 %v2704_v59  ;;  %v462_v59 = vunpack.c.h.b16 %v184_v48  ;;  %v2618_v48 = vld [vmem:[#allocation7 + $0x28] sm:$0xff] }
  0x46   :  { %1349 = vmatpush.bf16.msrb.mxu2 %v2712_v60  ;;  %v2749_v60 = vld [vmem:[#allocation8 + $0x2c0] sm:$0xff] }
  0x47   :  { %1362 = vmatpush.bf16.msrb.mxu3 %v2720_v61  ;;  %v475_v61 = vpack.c.b16 %v459_v50, %v459_v50  ;;  %v2634_v50 = vld [vmem:[#allocation7 + $0xa8] sm:$0xff] }
  0x48   :  { %1324 = vmatpush.bf16.msrb.mxu0 %v2695_v62  ;;  %v477_v62 = vpack.c.b16 %v461_v53, %v461_v53  ;;  %v2625_v53 = vld [vmem:[#allocation7 + $0x60] sm:$0xff] }
  0x49   :  { %1337 = vmatpush.bf16.msrb.mxu1 %v2703_v63  ;;  %v2788_v63 = vld [vmem:[#allocation8 + $0x3f8] sm:$0xff] }
  0x4a   :  { %1350 = vmatpush.bf16.msrb.mxu2 %v2711_v0  ;;  %v476_v0 = vpack.c.b16 %v460_v56, %v460_v56  ;;  %v2616_v56 = vld [vmem:[#allocation7 + $0x18] sm:$0xff] }
  0x4b   :  { %1363 = vmatpush.bf16.msrb.mxu3 %v2719_v1  ;;  %v2763_v1 = vld [vmem:[#allocation8 + $0x330] sm:$0xff] }
  0x4c   :  { %1325 = vmatpush.bf16.msrb.mxu0 %v2694_v2  ;;  %v478_v2 = vpack.c.b16 %v462_v59, %v462_v59  ;;  %v2640_v59 = vld [vmem:[#allocation7 + $0xd8] sm:$0xff] }
  0x4d   :  { %1338 = vmatpush.bf16.msrb.mxu1 %v2702_v3  ;;  %v2771_v3 = vld [vmem:[#allocation8 + $0x370] sm:$0xff] }
  0x4e   :  { %1351 = vmatpush.bf16.msrb.mxu2 %v2710_v4  ;;  %v2779_v4 = vld [vmem:[#allocation8 + $0x3b0] sm:$0xff] }
  0x4f   :  { %1364 = vmatpush.bf16.msrb.mxu3 %v2718_v7  ;;  %v2770_v7 = vld [vmem:[#allocation8 + $0x368] sm:$0xff] }
  0x50   :  { %1326 = vmatpush.bf16.msrb.mxu0 %v2693_v8  ;;  %v2778_v8 = vld [vmem:[#allocation8 + $0x3a8] sm:$0xff] }
  0x51   :  { %1339 = vmatpush.bf16.msrb.mxu1 %v2701_v10  ;;  %v2761_v10 = vld [vmem:[#allocation8 + $0x320] sm:$0xff] }
  0x52   :  { %1352 = vmatpush.bf16.msrb.mxu2 %v2709_v11  ;;  %v2769_v11 = vld [vmem:[#allocation8 + $0x360] sm:$0xff] }
  0x53   :  { %1365 = vmatpush.bf16.msrb.mxu3 %v2717_v17  ;;  %1327 = vmatmul.bf16.vlgmr.msrb.gmra.mxu0 %v471_v21  ;;  %v2784_v17 = vld [vmem:[#allocation8 + $0x3d8] sm:$0xff]  ;;  %v2783_v21 = vld [vmem:[#allocation8 + $0x3d0] sm:$0xff] }
  0x54   :  { %1371 = vmatpush.bf16.msra.mxu0 %v2732_v14  ;;  %1340 = vmatmul.bf16.vlgmr.msrb.gmra.mxu1 %v472_v22  ;;  %v2760_v14 = vld [vmem:[#allocation8 + $0x318] sm:$0xff]  ;;  %v2758_v22 = vld [vmem:[#allocation8 + $0x308] sm:$0xff] }
  0x55   :  { %1384 = vmatpush.bf16.msra.mxu1 %v2740_v15  ;;  %1353 = vmatmul.bf16.vlgmr.msrb.gmra.mxu2 %v473_v20  ;;  %v2768_v15 = vld [vmem:[#allocation8 + $0x358] sm:$0xff]  ;;  %v2775_v20 = vld [vmem:[#allocation8 + $0x390] sm:$0xff] }
  0x56   :  { %1397 = vmatpush.bf16.msra.mxu2 %v2748_v16  ;;  %1366 = vmatmul.bf16.vlgmr.msrb.gmra.mxu3 %v474_v26  ;;  %v2776_v16 = vld [vmem:[#allocation8 + $0x398] sm:$0xff] }
  0x57   :  { %1410 = vmatpush.bf16.msra.mxu3 %v2756_v19  ;;  %v2767_v19 = vld [vmem:[#allocation8 + $0x350] sm:$0xff]  ;;  %v186_v26 = vld [vmem:[#allocation5 + $0x38] sm:$0xff] }
  0x58   :  { %1372 = vmatpush.bf16.msra.mxu0 %v2731_v23  ;;  %v2766_v23 = vld [vmem:[#allocation8 + $0x348] sm:$0xff] }
  0x59   :  { %1385 = vmatpush.bf16.msra.mxu1 %v2739_v24  ;;  %v185_v24 = vld [vmem:[#allocation5 + $0x30] sm:$0xff] }
  0x5a   :  { %1398 = vmatpush.bf16.msra.mxu2 %v2747_v25  ;;  %v2774_v25 = vld [vmem:[#allocation8 + $0x388] sm:$0xff] }
  0x5b   :  { %1411 = vmatpush.bf16.msra.mxu3 %v2755_v27  ;;  %v2782_v27 = vld [vmem:[#allocation8 + $0x3c8] sm:$0xff] }
  0x5c   :  { %1373 = vmatpush.bf16.msra.mxu0 %v2730_v28  ;;  %v2757_v28 = vld [vmem:[#allocation8 + $0x300] sm:$0xff] }
  0x5d   :  { %1386 = vmatpush.bf16.msra.mxu1 %v2738_v29  ;;  %v463_v29 = vunpack.c.l.b16 %v185_v24 }
  0x5e   :  { %1399 = vmatpush.bf16.msra.mxu2 %v2746_v30  ;;  %v2765_v30 = vld [vmem:[#allocation8 + $0x340] sm:$0xff] }
  0x5f   :  { %1412 = vmatpush.bf16.msra.mxu3 %v2754_v31  ;;  %v2620_v31 = vld [vmem:[#allocation7 + $0x38] sm:$0xff] }
  0x60   :  { %1374 = vmatpush.bf16.msra.mxu0 %v2729_v32  ;;  %v465_v32 = vunpack.c.l.b16 %v186_v26 }
  0x61   :  { %1387 = vmatpush.bf16.msra.mxu1 %v2737_v33  ;;  %v464_v33 = vunpack.c.h.b16 %v185_v24  ;;  %v2649_v24 = vld [vmem:[#allocation7 + $0x120] sm:$0xff] }
  0x62   :  { %1400 = vmatpush.bf16.msra.mxu2 %v2745_v34  ;;  %v2773_v34 = vld [vmem:[#allocation8 + $0x380] sm:$0xff] }
  0x63   :  { %1413 = vmatpush.bf16.msra.mxu3 %v2753_v35  ;;  %v2628_v35 = vld [vmem:[#allocation7 + $0x78] sm:$0xff] }
  0x64   :  { %1375 = vmatpush.bf16.msra.mxu0 %v2728_v36  ;;  %v466_v36 = vunpack.c.h.b16 %v186_v26  ;;  %v2657_v26 = vld [vmem:[#allocation7 + $0x160] sm:$0xff] }
  0x65   :  { %1388 = vmatpush.bf16.msra.mxu1 %v2736_v37  ;;  %v2636_v37 = vld [vmem:[#allocation7 + $0xb8] sm:$0xff] }
  0x66   :  { %1401 = vmatpush.bf16.msra.mxu2 %v2744_v38  ;;  %v2781_v38 = vld [vmem:[#allocation8 + $0x3c0] sm:$0xff] }
  0x67   :  { %1414 = vmatpush.bf16.msra.mxu3 %v2752_v39  ;;  %v479_v39 = vpack.c.b16 %v463_v29, %v463_v29  ;;  %v2648_v29 = vld [vmem:[#allocation7 + $0x118] sm:$0xff] }
  0x68   :  { %1376 = vmatpush.bf16.msra.mxu0 %v2727_v40  ;;  %v2644_v40 = vld [vmem:[#allocation7 + $0xf8] sm:$0xff] }
  0x69   :  { %1389 = vmatpush.bf16.msra.mxu1 %v2735_v41  ;;  %v481_v41 = vpack.c.b16 %v465_v32, %v465_v32  ;;  %v2647_v32 = vld [vmem:[#allocation7 + $0x110] sm:$0xff] }
  0x6a   :  { %1402 = vmatpush.bf16.msra.mxu2 %v2743_v42  ;;  %v480_v42 = vpack.c.b16 %v464_v33, %v464_v33 }
  0x6b   :  { %1415 = vmatpush.bf16.msra.mxu3 %v2751_v43  ;;  %v482_v43 = vpack.c.b16 %v466_v36, %v466_v36 }
  0x6c   :  { %1377 = vmatpush.bf16.msra.mxu0 %v2726_v44  ;;  %v2619_v44 = vld [vmem:[#allocation7 + $0x30] sm:$0xff] }
  0x6d   :  { %1390 = vmatpush.bf16.msra.mxu1 %v2734_v45  ;;  %v2627_v45 = vld [vmem:[#allocation7 + $0x70] sm:$0xff] }
  0x6e   :  { %1403 = vmatpush.bf16.msra.mxu2 %v2742_v47  ;;  %v2643_v47 = vld [vmem:[#allocation7 + $0xf0] sm:$0xff] }
  0x6f   :  { %1416 = vmatpush.bf16.msra.mxu3 %v2750_v49  ;;  %v2626_v49 = vld [vmem:[#allocation7 + $0x68] sm:$0xff] }
  0x70   :  { %1378 = vmatpush.bf16.msra.mxu0 %v2725_v51  ;;  %v2642_v51 = vld [vmem:[#allocation7 + $0xe8] sm:$0xff] }
  0x71   :  { %1391 = vmatpush.bf16.msra.mxu1 %v2733_v52  ;;  %v2617_v52 = vld [vmem:[#allocation7 + $0x20] sm:$0xff] }
  0x72   :  { %1404 = vmatpush.bf16.msra.mxu2 %v2741_v54  ;;  %v2633_v54 = vld [vmem:[#allocation7 + $0xa0] sm:$0xff] }
  0x73   :  { %1417 = vmatpush.bf16.msra.mxu3 %v2749_v60  ;;  %1379 = vmatmul.bf16.vlgmr.msra.gmra.mxu0 %v475_v61  ;;  %v2615_v60 = vld [vmem:[#allocation7 + $0x10] sm:$0xff] }
  0x74   :  { %1423 = vmatpush.bf16.msrb.mxu0 %v2764_v55  ;;  %1392 = vmatmul.bf16.vlgmr.msra.gmra.mxu1 %v476_v0  ;;  %v2641_v55 = vld [vmem:[#allocation7 + $0xe0] sm:$0xff]  ;;  %v2623_v61 = vld [vmem:[#allocation7 + $0x50] sm:$0xff]  ;;  %v2614_v0 = vld [vmem:[#allocation7 + $0x8] sm:$0xff] }
  0x75   :  { %1436 = vmatpush.bf16.msrb.mxu1 %v2772_v57  ;;  %1405 = vmatmul.bf16.vlgmr.msra.gmra.mxu2 %v477_v62  ;;  %v2624_v57 = vld [vmem:[#allocation7 + $0x58] sm:$0xff]  ;;  %v2631_v62 = vld [vmem:[#allocation7 + $0x90] sm:$0xff] }
  0x76   :  { %1449 = vmatpush.bf16.msrb.mxu2 %v2780_v58  ;;  %1418 = vmatmul.bf16.vlgmr.msra.gmra.mxu3 %v478_v2  ;;  %v2632_v58 = vld [vmem:[#allocation7 + $0x98] sm:$0xff]  ;;  %v2622_v2 = vld [vmem:[#allocation7 + $0x48] sm:$0xff] }
  0x77   :  { %1462 = vmatpush.bf16.msrb.mxu3 %v2788_v63  ;;  %v2639_v63 = vld [vmem:[#allocation7 + $0xd0] sm:$0xff] }
  0x78   :  { %1424 = vmatpush.bf16.msrb.mxu0 %v2763_v1  ;;  %v80_v1 = vld [vmem:[#allocation2] sm:$0xff] }
  0x79   :  { %1437 = vmatpush.bf16.msrb.mxu1 %v2771_v3  ;;  %v2630_v3 = vld [vmem:[#allocation7 + $0x88] sm:$0xff] }
  0x7a   :  { %1450 = vmatpush.bf16.msrb.mxu2 %v2779_v4  ;;  %v81_v4 = vld [vmem:[#allocation2 + $0x8] sm:$0xff] }
  0x7b   :  { %1463 = vmatpush.bf16.msrb.mxu3 %v2787_v5  ;;  %v2638_v5 = vld [vmem:[#allocation7 + $0xc8] sm:$0xff] }
  0x7c   :  { %1425 = vmatpush.bf16.msrb.mxu0 %v2762_v6  ;;  %v1478_v6 = vunpack.c.l.b16 %v80_v1 }
  0x7d   :  { %1438 = vmatpush.bf16.msrb.mxu1 %v2770_v7  ;;  %v2613_v7 = vld [vmem:[#allocation7] sm:$0xff] }
  0x7e   :  { %1451 = vmatpush.bf16.msrb.mxu2 %v2778_v8  ;;  %v1480_v8 = vunpack.c.l.b16 %v81_v4 }
  0x7f   :  { %1464 = vmatpush.bf16.msrb.mxu3 %v2786_v9  ;;  %v1479_v9 = vunpack.c.h.b16 %v80_v1 }
  0x80   :  { %1426 = vmatpush.bf16.msrb.mxu0 %v2761_v10  ;;  %v2621_v10 = vld [vmem:[#allocation7 + $0x40] sm:$0xff] }
  0x81   :  { %1439 = vmatpush.bf16.msrb.mxu1 %v2769_v11  ;;  %v2629_v11 = vld [vmem:[#allocation7 + $0x80] sm:$0xff] }
  0x82   :  { %1452 = vmatpush.bf16.msrb.mxu2 %v2777_v12  ;;  %v2652_v12 = vld [vmem:[#allocation7 + $0x138] sm:$0xff] }
  0x83   :  { %1465 = vmatpush.bf16.msrb.mxu3 %v2785_v13  ;;  %v2660_v13 = vld [vmem:[#allocation7 + $0x178] sm:$0xff] }
  0x84   :  { %1427 = vmatpush.bf16.msrb.mxu0 %v2760_v14  ;;  %v1481_v14 = vunpack.c.h.b16 %v81_v4 }
  0x85   :  { %1440 = vmatpush.bf16.msrb.mxu1 %v2768_v15  ;;  %v2637_v15 = vld [vmem:[#allocation7 + $0xc0] sm:$0xff] }
  0x86   :  { %1453 = vmatpush.bf16.msrb.mxu2 %v2776_v16  ;;  %v1484_v16 = vpack.c.b16 %v1478_v6, %v1478_v6 }
  0x87   :  { %1466 = vmatpush.bf16.msrb.mxu3 %v2784_v17  ;;  %v1486_v17 = vpack.c.b16 %v1480_v8, %v1480_v8 }
  0x88   :  { %1428 = vmatpush.bf16.msrb.mxu0 %v2759_v18  ;;  %v1485_v18 = vpack.c.b16 %v1479_v9, %v1479_v9 }
  0x89   :  { %1441 = vmatpush.bf16.msrb.mxu1 %v2767_v19  ;;  %v1487_v19 = vpack.c.b16 %v1481_v14, %v1481_v14 }
  0x8a   :  { %1454 = vmatpush.bf16.msrb.mxu2 %v2775_v20  ;;  %v2651_v20 = vld [vmem:[#allocation7 + $0x130] sm:$0xff] }
  0x8b   :  { %1467 = vmatpush.bf16.msrb.mxu3 %v2783_v21  ;;  %v2659_v21 = vld [vmem:[#allocation7 + $0x170] sm:$0xff] }
  0x8c   :  { %1429 = vmatpush.bf16.msrb.mxu0 %v2758_v22  ;;  %v2650_v22 = vld [vmem:[#allocation7 + $0x128] sm:$0xff] }
  0x8d   :  { %1442 = vmatpush.bf16.msrb.mxu1 %v2766_v23  ;;  %v2658_v23 = vld [vmem:[#allocation7 + $0x168] sm:$0xff] }
  0x8e   :  { %1455 = vmatpush.bf16.msrb.mxu2 %v2774_v25 }
  0x8f   :  { %1468 = vmatpush.bf16.msrb.mxu3 %v2782_v27 }
  0x90   :  { %1430 = vmatpush.bf16.msrb.mxu0 %v2757_v28 }
  0x91   :  { %1443 = vmatpush.bf16.msrb.mxu1 %v2765_v30  ;;  %v2656_v30 = vld [vmem:[#allocation7 + $0x158] sm:$0xff] }
  0x92   :  { %1456 = vmatpush.bf16.msrb.mxu2 %v2773_v34 }
  0x93   :  { %1469 = vmatpush.bf16.msrb.mxu3 %v2781_v38  ;;  %1431 = vmatmul.bf16.vlgmr.msrb.gmra.mxu0 %v479_v39  ;;  %v2646_v39 = vld [vmem:[#allocation7 + $0x108] sm:$0xff] }
  0x94   :  { %1784 = vmatpush.bf16.msra.mxu0 %v2620_v31  ;;  %1444 = vmatmul.bf16.vlgmr.msrb.gmra.mxu1 %v480_v42 }
  0x95   :  { %1797 = vmatpush.bf16.msra.mxu1 %v2628_v35  ;;  %1457 = vmatmul.bf16.vlgmr.msrb.gmra.mxu2 %v481_v41  ;;  %v2655_v35 = vld [vmem:[#allocation7 + $0x150] sm:$0xff]  ;;  %v2654_v41 = vld [vmem:[#allocation7 + $0x148] sm:$0xff] }
  0x96   :  { %1810 = vmatpush.bf16.msra.mxu2 %v2636_v37  ;;  %1470 = vmatmul.bf16.vlgmr.msrb.gmra.mxu3 %v482_v43 }
  0x97   :  { %1823 = vmatpush.bf16.msra.mxu3 %v2644_v40  ;;  %v82_v40 = vld [vmem:[#allocation2 + $0x10] sm:$0xff] }
  0x98   :  { %1785 = vmatpush.bf16.msra.mxu0 %v2619_v44  ;;  %v1482_v42 = vunpack.c.l.b16 %v82_v40  ;;  %v2645_v44 = vld [vmem:[#allocation7 + $0x100] sm:$0xff] }
  0x99   :  { %1798 = vmatpush.bf16.msra.mxu1 %v2627_v45  ;;  %v1483_v45 = vunpack.c.h.b16 %v82_v40 }
  0x9a   :  { %1811 = vmatpush.bf16.msra.mxu2 %v2635_v46  ;;  %v2653_v46 = vld [vmem:[#allocation7 + $0x140] sm:$0xff] }
  0x9b   :  { %1824 = vmatpush.bf16.msra.mxu3 %v2643_v47 }
  0x9c   :  { %1786 = vmatpush.bf16.msra.mxu0 %v2618_v48  ;;  %v1488_v48 = vpack.c.b16 %v1482_v42, %v1482_v42 }
  0x9d   :  { %1799 = vmatpush.bf16.msra.mxu1 %v2626_v49  ;;  %v1489_v49 = vpack.c.b16 %v1483_v45, %v1483_v45 }
  0x9e   :  { %1812 = vmatpush.bf16.msra.mxu2 %v2634_v50 }
  0x9f   :  { %1825 = vmatpush.bf16.msra.mxu3 %v2642_v51 }
  0xa0   :  { %1787 = vmatpush.bf16.msra.mxu0 %v2617_v52 }
  0xa1   :  { %1800 = vmatpush.bf16.msra.mxu1 %v2625_v53 }
  0xa2   :  { %1813 = vmatpush.bf16.msra.mxu2 %v2633_v54 }
  0xa3   :  { %1826 = vmatpush.bf16.msra.mxu3 %v2641_v55 }
  0xa4   :  { %1788 = vmatpush.bf16.msra.mxu0 %v2616_v56 }
  0xa5   :  { %1801 = vmatpush.bf16.msra.mxu1 %v2624_v57 }
  0xa6   :  { %1814 = vmatpush.bf16.msra.mxu2 %v2632_v58 }
  0xa7   :  { %1827 = vmatpush.bf16.msra.mxu3 %v2640_v59 }
  0xa8   :  { %1789 = vmatpush.bf16.msra.mxu0 %v2615_v60 }
  0xa9   :  { %1802 = vmatpush.bf16.msra.mxu1 %v2623_v61 }
  0xaa   :  { %1815 = vmatpush.bf16.msra.mxu2 %v2631_v62 }
  0xab   :  { %1828 = vmatpush.bf16.msra.mxu3 %v2639_v63 }
  0xac   :  { %1790 = vmatpush.bf16.msra.mxu0 %v2614_v0 }
  0xad   :  { %1803 = vmatpush.bf16.msra.mxu1 %v2622_v2 }
  0xae   :  { %1816 = vmatpush.bf16.msra.mxu2 %v2630_v3 }
  0xaf   :  { %1829 = vmatpush.bf16.msra.mxu3 %v2638_v5 }
  0xb0   :  { %1791 = vmatpush.bf16.msra.mxu0 %v2613_v7  ;;  %v1276_v25 = vpop.f32.mrf.mxu0 }
  0xb1   :  { %1804 = vmatpush.bf16.msra.mxu1 %v2621_v10  ;;  %v1289_v27 = vpop.f32.mrf.mxu1 }
  0xb2   :  { %1817 = vmatpush.bf16.msra.mxu2 %v2629_v11  ;;  %v1290_v28 = vadd.f32 %v1289_v27, %v1276_v25 }
  0xb3   :  { %1830 = vmatpush.bf16.msra.mxu3 %v2637_v15  ;;  %1792 = vmatmul.bf16.vlgmr.msra.gmra.mxu0 %v1484_v16 }
  0xb4   :  { %1836 = vmatpush.bf16.msrb.mxu0 %v2652_v12  ;;  %1805 = vmatmul.bf16.vlgmr.msra.gmra.mxu1 %v1485_v18 }
  0xb5   :  { %1849 = vmatpush.bf16.msrb.mxu1 %v2660_v13  ;;  %1818 = vmatmul.bf16.vlgmr.msra.gmra.mxu2 %v1486_v17 }
  0xb6   :  { %1831 = vmatmul.bf16.vlgmr.msra.gmra.mxu3 %v1487_v19 }
  0xb8   :  { %1837 = vmatpush.bf16.msrb.mxu0 %v2651_v20  ;;  %v1302_v31 = vpop.f32.mrf.mxu2  ;;  %v1278_v34 = vpop.f32.mrf.mxu0 }
  0xb9   :  { %1850 = vmatpush.bf16.msrb.mxu1 %v2659_v21  ;;  %v1303_v33 = vadd.f32 %v1302_v31, %v1290_v28  ;;  %v1315_v36 = vpop.f32.mrf.mxu3  ;;  %v1291_v37 = vpop.f32.mrf.mxu1 }
  0xba   :  { %v2796_v37 = vld [vmem:[%s2988_s4] ss:$0 sm:$0xff]  ;;  %s2935_s4 = smov [#allocation10]  }
  0xbb   :  { %v1316_v38 = vadd.f32 %v1315_v36, %v1303_v33  ;;  %s1895_s13 = sshll.u32 %s2935_s4, 4  ;;  %s1896_s13 = int_to_ptr.vmem [resolvable:$true] %s1895_s13 }
  0xbc   :  { %1838 = vmatpush.bf16.msrb.mxu0 %v2650_v22 }
  0xbd   :  { %1851 = vmatpush.bf16.msrb.mxu1 %v2658_v23 }
  0xc0   :  { %1839 = vmatpush.bf16.msrb.mxu0 %v2649_v24  ;;  %v1304_v43 = vpop.f32.mrf.mxu2 }
  0xc1   :  { %1852 = vmatpush.bf16.msrb.mxu1 %v2657_v26  ;;  %v1317_v47 = vpop.f32.mrf.mxu3 }
  0xc4   :  { %1840 = vmatpush.bf16.msrb.mxu0 %v2648_v29 }
  0xc5   :  { %1853 = vmatpush.bf16.msrb.mxu1 %v2656_v30 }
  0xc8   :  { %1841 = vmatpush.bf16.msrb.mxu0 %v2647_v32 }
  0xc9   :  { %1854 = vmatpush.bf16.msrb.mxu1 %v2655_v35 }
  0xcc   :  { %1842 = vmatpush.bf16.msrb.mxu0 %v2646_v39 }
  0xcd   :  { %1855 = vmatpush.bf16.msrb.mxu1 %v2654_v41 }
  0xd0   :  { %1843 = vmatpush.bf16.msrb.mxu0 %v2645_v44  ;;  %v1328_v50 = vpop.f32.mrf.mxu0 }
  0xd1   :  { %1856 = vmatpush.bf16.msrb.mxu1 %v2653_v46  ;;  %v1341_v51 = vpop.f32.mrf.mxu1  ;;  %v1329_v52 = vadd.f32 %v1328_v50, %v1316_v38 }
  0xd3   :  { %1844 = vmatmul.bf16.vlgmr.msrb.gmra.mxu0 %v1488_v48  ;;  %v1342_v53 = vadd.f32 %v1341_v51, %v1329_v52 }
  0xd4   :  { %1857 = vmatmul.bf16.vlgmr.msrb.gmra.mxu1 %v1489_v49 }
  0xd8   :  { %v1354_v54 = vpop.f32.mrf.mxu2  ;;  %v1330_v57 = vpop.f32.mrf.mxu0 }
  0xd9   :  { %v1355_v55 = vadd.f32 %v1354_v54, %v1342_v53  ;;  %v1367_v56 = vpop.f32.mrf.mxu3  ;;  %v1343_v59 = vpop.f32.mrf.mxu1 }
  0xdb   :  { %v1368_v58 = vadd.f32 %v1367_v56, %v1355_v55 }
  0xe0   :  { %v1356_v60 = vpop.f32.mrf.mxu2 }
  0xe1   :  { %v1369_v61 = vpop.f32.mrf.mxu3 }
  0xf0   :  { %v1380_v62 = vpop.f32.mrf.mxu0 }
  0xf1   :  { %v1381_v63 = vadd.f32 %v1380_v62, %v1368_v58  ;;  %v1393_v0 = vpop.f32.mrf.mxu1 }
  0xf3   :  { %v1394_v1 = vadd.f32 %v1393_v0, %v1381_v63 }
  0xf8   :  { %v1406_v2 = vpop.f32.mrf.mxu2  ;;  %v1382_v3 = vpop.f32.mrf.mxu0 }
  0xf9   :  { %v1419_v4 = vpop.f32.mrf.mxu3  ;;  %v1395_v5 = vpop.f32.mrf.mxu1  ;;  %v1407_v17 = vadd.f32 %v1406_v2, %v1394_v1 }
  0xfb   :  { %v1420_v19 = vadd.f32 %v1419_v4, %v1407_v17 }
 0x100   :  { %v1408_v6 = vpop.f32.mrf.mxu2 }
 0x101   :  { %v1421_v7 = vpop.f32.mrf.mxu3 }
 0x110   :  { %v1432_v8 = vpop.f32.mrf.mxu0 }
 0x111   :  { %v1445_v9 = vpop.f32.mrf.mxu1  ;;  %v1433_v20 = vadd.f32 %v1432_v8, %v1420_v19 }
 0x113   :  { %v1446_v25 = vadd.f32 %v1445_v9, %v1433_v20 }
 0x118   :  { %v1458_v10 = vpop.f32.mrf.mxu2  ;;  %v1434_v12 = vpop.f32.mrf.mxu0 }
 0x119   :  { %v1471_v11 = vpop.f32.mrf.mxu3  ;;  %v1447_v13 = vpop.f32.mrf.mxu1  ;;  %v1459_v26 = vadd.f32 %v1458_v10, %v1446_v25 }
 0x11b   :  { %v1472_v28 = vadd.f32 %v1471_v11, %v1459_v26 }
 0x120   :  { %v1460_v14 = vpop.f32.mrf.mxu2 }
 0x121   :  { %v1473_v15 = vpop.f32.mrf.mxu3 }
 0x130   :  { %v1793_v16 = vpop.f32.mrf.mxu0 }
 0x131   :  { %v1806_v18 = vpop.f32.mrf.mxu1  ;;  %v1794_v30 = vadd.f32 %v1793_v16, %v1472_v28 }
 0x133   :  { %v1807_v31 = vadd.f32 %v1806_v18, %v1794_v30 }
 0x138   :  { %v1819_v21 = vpop.f32.mrf.mxu2  ;;  %v1795_v22 = vpop.f32.mrf.mxu0 }
 0x139   :  { %v1832_v23 = vpop.f32.mrf.mxu3  ;;  %v1808_v24 = vpop.f32.mrf.mxu1  ;;  %v1820_v32 = vadd.f32 %v1819_v21, %v1807_v31 }
 0x13b   :  { %v1833_v33 = vadd.f32 %v1832_v23, %v1820_v32 }
 0x140   :  { %v1821_v27 = vpop.f32.mrf.mxu2 }
 0x141   :  { %v1834_v29 = vpop.f32.mrf.mxu3 }
 0x150   :  { %v1845_v34 = vpop.f32.mrf.mxu0 }
 0x151   :  { %v1846_v35 = vadd.f32 %v1845_v34, %v1833_v33  ;;  %v1858_v36 = vpop.f32.mrf.mxu1 }
 0x153   :  { %v1859_v38 = vadd.f32 %v1858_v36, %v1846_v35 }
 0x155   :  { %v1866_v39 = vadd.f32 %v2796_v37, %v1859_v38 }
 0x157   :  { %1867 = vmax.xlane.f32.xlu0 %v1866_v39 }
 0x158   :  { %v1847_v40 = vpop.f32.mrf.mxu0 }
 0x159   :  { %v1860_v41 = vpop.f32.mrf.mxu1 }
 0x1ca   :  { %v1868_v42 = vpop.xlane.xlu0 %1867 }
 0x1cb   :  { %v1869_v43 = vsub.f32 %v1866_v39, %v1868_v42 }
 0x1cd   :  { %v1870_v44 = vmul.f32 1.442695, %v1869_v43 }
 0x1cf   :  { %2797 = vpow2.f32 %v1870_v44 }
 0x1d5   :  { %v2798_v45 = vpop.eup %2797 }
 0x1d6   :  { %1872 = vadd.xlane.f32.xlu0 %v2798_v45 }
 0x249   :  { %v1873_v46 = vpop.xlane.xlu0 %1872 }
 0x24a   :  { %2799 = vrcp.f32 %v1873_v46  ;;  %v1885_v50 = vand.u32 2147483648, %v1873_v46  ;;  %v1883_v52 = vand.u32 2147483647, %v1873_v46  ;;  %vm1879_vm1 = vweird.f32 %v1873_v46 }
 0x24c   :  { %v1886_v54 = vor.u32 1.1754944e-38, %v1885_v50  ;;  %vm1884_vm3 = vcmp.eq.f32.partialorder %v1883_v52, 8.507059e+37 }
 0x250   :  { %v2800_v47 = vpop.eup %2799 }
 0x251   :  { %v1875_v48 = vmul.f32 %v2800_v47, %v1873_v46  ;;  %vm1880_vm0 = vweird.f32 %v2800_v47 }
 0x252   :  { %vm1881_vm2 = vmor %vm1879_vm1, %vm1880_vm0 }
 0x253   :  { %v1876_v49 = vsub.f32 1.0, %v1875_v48 }
 0x255   :  { %v1877_v51 = vmul.f32 %v2800_v47, %v1876_v49 }
 0x257   :  { %v1878_v53 = vadd.f32 %v2800_v47, %v1877_v51 }
 0x259   :  { %v1882_v55 = vsel %vm1881_vm2, %v2800_v47, %v1878_v53 }
 0x25a   :  { %v1887_v56 = vsel %vm1884_vm3, %v1886_v54, %v1882_v55 }
 0x25b   :  { %v1888_v57 = vmul.f32 %v2798_v45, %v1887_v56 }
 0x25d   :  { %1889 = vst [vmem:[#allocation10] sm:$0xff] %v1888_v57 }
 0x25e   :  { %1900 = dma.vmem_to_hbm [thread:$0]  %s1896_s13, 128, %s1898_s16, [#allocation4]  }
 0x25f   :  { %2927 = dma.done.wait [#allocation4], 128  }
 0x260   :  { %2928 = vsyncadd [#allocation4], 4294967168 }
 0x261   :  { %1905 = vsyncpa [#allocation3], 1 }
 0x262   :  { %1906 = vsyncpa [#allocation6], 1 }
 0x263   :  { %1907 = vsyncpa [#allocation9], 1 }
 0x264   :  { %1908 = vsyncpa [#allocation4], 1 }

</bundles_post_ra>
